<compile_context>
chip_gen: v6e
topology: v6e:2x2x1
jax: 0.10.0
libtpu: 0.0.40
codegen_flags: <defaults>
</compile_context>

<pallas_src>
import functools
import math

import jax
import jax.numpy as jnp
from jax import lax
from jax.experimental import pallas as pl
from jax.experimental.pallas import tpu as pltpu


def _round_up(x, m):
    return ((x + m - 1) // m) * m


# ----------------------------------------------------------------------------
# Pallas kernel: one (tm, tn) output tile of  Y = X @ W.T + b
# ----------------------------------------------------------------------------
def _linear_kernel(x_ref, w_ref, b_ref, o_ref, acc_ref):
    k = pl.program_id(2)

    @pl.when(k == 0)
    def _():
        # Fold the bias into accumulator init instead of re-adding it on
        # every reduction step.
        acc_ref[...] = jnp.broadcast_to(
            b_ref[...].astype(jnp.float32), acc_ref.shape)

    # x tile: (tm, tk), w tile: (tn, tk) in native nn.Linear layout.
    # Contract both on their last axis -> (tm, tn); MXU gets the
    # rhs-transposed feed without any HBM-side transpose.
    acc_ref[...] += lax.dot_general(
        x_ref[...], w_ref[...],
        dimension_numbers=(((1,), (1,)), ((), ())),
        preferred_element_type=jnp.float32)

    @pl.when(k == pl.num_programs(2) - 1)
    def _():
        o_ref[...] = acc_ref[...].astype(o_ref.dtype)


# ----------------------------------------------------------------------------
# Per-generation tile selection
# ----------------------------------------------------------------------------
def _select_tiles(M, N, K, in_bytes, out_bytes, min_sublane):
    try:
        kind = jax.devices()[0].device_kind.lower()
    except Exception:  # pragma: no cover
        kind = ""
    # v5e/v6e: 128 MiB physical VMEM -> large budget.  v7x (or unknown):
    # 64 MiB per TensorCore -> keep <= ~48 MiB with headroom for internal
    # scratch, and do not carry the bigger v6e tiles over.
    big_vmem = ("v5" in kind) or ("v6" in kind)
    if big_vmem:
        vmem_limit = 96 * 1024 * 1024
        budget = 80 * 1024 * 1024
        tm_cands = (1024, 512, 256, 128, 64, 32, 16, 8)
    else:
        vmem_limit = 48 * 1024 * 1024
        budget = 36 * 1024 * 1024
        tm_cands = (512, 256, 128, 64, 32, 16, 8)

    # --- M tile: minimize row-padding waste, prefer larger tiles on ties ----
    tm_cands = tuple(t for t in tm_cands if t >= min_sublane)
    tm, best_waste = tm_cands[0], None
    for t in tm_cands:
        waste = _round_up(M, t) - M
        if best_waste is None or waste < best_waste:
            tm, best_waste = t, waste
    M_pad = _round_up(M, tm)

    # --- N tile: lane-dense output; 256-multiples for the 256-wide MXU ------
    lane_mult = 256 if N >= 256 else 128
    N_pad = _round_up(N, lane_mult)
    tn_cands = [t for t in (512, 256, 128) if N_pad % t == 0]
    tn = tn_cands[0]
    if M_pad // tm == 1:
        # Single M tile: keep >= 2 parallel output tiles so v7x's second
        # TensorCore is not idle (pick the largest tn that still splits N).
        for t in tn_cands:
            if N_pad // t >= 2:
                tn = t
                break

    # --- K tile: as large as the double-buffered VMEM budget allows ---------
    K_pad = _round_up(K, 128)
    tk = 128
    for t in (K_pad, 2048, 1024, 512, 256, 128):
        if t > K_pad or K_pad % t != 0:
            continue
        footprint = (2 * in_bytes * (tm * t + tn * t)    # x + W, double-buffered
                     + 4 * tm * tn                       # f32 accumulator
                     + 2 * out_bytes * tm * tn           # output, double-buffered
                     + 2 * 4 * tn)                       # bias
        if footprint <= budget:
            tk = t
            break
    return tm, tn, tk, M_pad, N_pad, K_pad, vmem_limit


@functools.partial(jax.jit, static_argnames=("use_bf16",))
def lowrank_linear_forward(x, weight, bias, use_bf16=False):
    """Pallas implementation of LowRank_Linear.forward.

    x:      (..., in_features)          float32
    weight: (out_features, in_features) float32  (native nn.Linear layout)
    bias:   (out_features,)             float32
    returns (..., out_features)         x.dtype

    use_bf16=True feeds the MXU bf16 tiles (f32 accumulation retained); the
    default keeps the module-faithful f32 path.
    """
    *lead, K = x.shape
    N, Kw = weight.shape
    assert Kw == K, "weight.shape[1] must equal in_features"

    out_dtype = x.dtype
    x2 = x.reshape(-1, K)
    M = x2.shape[0]

    in_dtype = jnp.bfloat16 if use_bf16 else x2.dtype
    in_bytes = jnp.dtype(in_dtype).itemsize
    out_bytes = jnp.dtype(out_dtype).itemsize
    min_sublane = 16 if use_bf16 else 8  # bf16 sublane tiling is (16, 128)

    tm, tn, tk, M_pad, N_pad, K_pad, vmem_limit = _select_tiles(
        M, N, K, in_bytes, out_bytes, min_sublane)

    # Only pad when actually required.  Zero padding along K contributes
    # nothing to the dot product (semantically required); M/N padding only
    # satisfies tiling and is sliced off afterwards.
    if M_pad == M and K_pad == K:
        xp = x2
    else:
        xp = jnp.pad(x2, ((0, M_pad - M), (0, K_pad - K)))
    if N_pad == N and K_pad == K:
        wp = weight                                   # zero-copy: native layout
    else:
        wp = jnp.pad(weight, ((0, N_pad - N), (0, K_pad - K)))
    bp = (bias if N_pad == N else jnp.pad(bias, (0, N_pad - N))).reshape(1, N_pad)

    if use_bf16:
        xp = xp.astype(jnp.bfloat16)
        wp = wp.astype(jnp.bfloat16)

    grid = (M_pad // tm, N_pad // tn, K_pad // tk)

    cost = pl.CostEstimate(
        flops=2 * M_pad * N_pad * K_pad,
        bytes_accessed=(M_pad * K_pad * in_bytes
                        + N_pad * K_pad * in_bytes
                        + M_pad * N_pad * out_bytes
                        + N_pad * 4),
        transcendentals=0)

    out = pl.pallas_call(
        _linear_kernel,
        out_shape=jax.ShapeDtypeStruct((M_pad, N_pad), out_dtype),
        grid_spec=pltpu.PrefetchScalarGridSpec(
            num_scalar_prefetch=0,
            grid=grid,
            in_specs=[
                pl.BlockSpec((tm, tk), lambda i, j, k: (i, k)),
                # Weight stays (N, K); no HBM transpose needed.
                pl.BlockSpec((tn, tk), lambda i, j, k: (j, k)),
                pl.BlockSpec((1, tn), lambda i, j, k: (0, j)),
            ],
            out_specs=pl.BlockSpec((tm, tn), lambda i, j, k: (i, j)),
            scratch_shapes=[pltpu.VMEM((tm, tn), jnp.float32)],
        ),
        compiler_params=pltpu.CompilerParams(
            dimension_semantics=("parallel", "parallel", "arbitrary"),
            vmem_limit_bytes=vmem_limit,
        ),
        cost_estimate=cost,
    )(xp, wp, bp)

    if M_pad != M or N_pad != N:
        out = out[:M, :N]                              # drop row / lane padding
    return out.reshape(*lead, N)


# ----------------------------------------------------------------------------
# Deterministic parameter construction mirroring LowRank_Linear.__init__
# ----------------------------------------------------------------------------
def build_lowrank_linear_params(key, in_features, out_features):
    # reset_parameters() zeroes layer.weight.  self.bias is None, so
    # layer.bias keeps nn.Linear's default init: U(-1/sqrt(fan_in), +bound).
    # TODO(synk): the low-rank u/s/vh/rank attributes are training-time
    # metadata only and never enter forward(), so they are not modeled here.
    weight = jnp.zeros((out_features, in_features), dtype=jnp.float32)
    bound = 1.0 / math.sqrt(in_features) if in_features > 0 else 0.0
    bias = jax.random.uniform(
        key, (out_features,), minval=-bound, maxval=bound, dtype=jnp.float32)
    return weight, bias


if __name__ == "__main__":
    # Small, module-consistent shapes: batch=2, seq=8, hidden (in_features)=32.
    batch, seq, in_features, out_features = 2, 8, 32, 16

    key = jax.random.PRNGKey(0)
    k_x, k_b, k_w = jax.random.split(key, 3)

    x = jax.random.normal(k_x, (batch, seq, in_features), dtype=jnp.float32)
    weight_zero, bias = build_lowrank_linear_params(
        k_b, in_features, out_features)

    # Internal correctness check with a non-trivial weight to exercise the
    # full matmul + bias path of the Pallas kernel (f32, module-faithful).
    w_dense = jax.random.normal(
        k_w, (out_features, in_features), dtype=jnp.float32)
    y_chk = lowrank_linear_forward(x, w_dense, bias)
    y_ref = x @ w_dense.T + bias
    assert y_chk.shape == (batch, seq, out_features)
    assert jnp.allclose(y_chk, y_ref, atol=1e-4, rtol=1e-4), "matmul mismatch"

    # Optional bf16 MXU-feed path (f32 accumulation), looser tolerance.
    y_bf16 = lowrank_linear_forward(x, w_dense, bias, use_bf16=True)
    jax.block_until_ready(y_bf16)
    assert y_bf16.shape == (batch, seq, out_features)
    assert jnp.allclose(y_bf16, y_ref, atol=3e-1, rtol=5e-2), "bf16 mismatch"

    # Module-faithful forward: reset_parameters() zeroed the weight, so
    # LowRank_Linear(x) == broadcast bias.
    y = lowrank_linear_forward(x, weight_zero, bias)
    jax.block_until_ready(y)
    y_ref0 = x @ weight_zero.T + bias
    assert y.shape == (batch, seq, out_features)
    assert jnp.allclose(y, y_ref0, atol=1e-5, rtol=1e-5), \
        "module-faithful mismatch"

    print("KERNEL_OK")
</pallas_src>

<mosaic_0001>
module attributes {stable_mosaic.version = 11 : i64} {
  func.func @_linear_kernel(%arg0: i32, %arg1: i32, %arg2: i32, %arg3: memref<16x128xf32, #tpu.memory_space<vmem>>, %arg4: memref<128x128xf32, #tpu.memory_space<vmem>>, %arg5: memref<1x128xf32, #tpu.memory_space<vmem>>, %arg6: memref<16x128xf32, #tpu.memory_space<vmem>>, %arg7: memref<16x128xf32, #tpu.memory_space<vmem>>) attributes {dimension_semantics = [#tpu.dimension_semantics<parallel>, #tpu.dimension_semantics<parallel>, #tpu.dimension_semantics<arbitrary>], iteration_bounds = array<i64: 1, 1, 1>, scalar_prefetch = 0 : i64, scratch_operands = 1 : i64, tpu.core_type = #tpu.core_type<tc>, window_params = [{transform_indices = @transform_0, window_bounds = array<i64: 16, 128>}, {transform_indices = @transform_1, window_bounds = array<i64: 128, 128>}, {transform_indices = @transform_2, window_bounds = array<i64: 1, 128>}, {transform_indices = @transform_3, window_bounds = array<i64: 16, 128>}]} {
    %c0_i32 = arith.constant 0 : i32
    %0 = arith.cmpi eq, %arg2, %c0_i32 : i32
    %1 = arith.extui %0 : i1 to i32
    %c0_i32_0 = arith.constant 0 : i32
    %2 = arith.cmpi ne, %1, %c0_i32_0 : i32
    scf.if %2 {
      %c0_10 = arith.constant 0 : index
      %c0_11 = arith.constant 0 : index
      %12 = vector.load %arg5[%c0_10, %c0_11] : memref<1x128xf32, #tpu.memory_space<vmem>>, vector<1x128xf32>
      %13 = vector.shape_cast %12 : vector<1x128xf32> to vector<1x128xf32>
      %14 = vector.broadcast %13 : vector<1x128xf32> to vector<16x128xf32>
      %c0_12 = arith.constant 0 : index
      %c0_13 = arith.constant 0 : index
      %15 = vector.load %arg7[%c0_12, %c0_13] : memref<16x128xf32, #tpu.memory_space<vmem>>, vector<16x128xf32>
      tpu.vector_store %arg7[%c0_12, %c0_13], %14 {strides = array<i32>} : memref<16x128xf32, #tpu.memory_space<vmem>>, vector<16x128xf32>,
    } else {
    }
    %c0 = arith.constant 0 : index
    %c0_1 = arith.constant 0 : index
    %3 = vector.load %arg7[%c0, %c0_1] : memref<16x128xf32, #tpu.memory_space<vmem>>, vector<16x128xf32>
    %c0_2 = arith.constant 0 : index
    %c0_3 = arith.constant 0 : index
    %4 = vector.load %arg3[%c0_2, %c0_3] : memref<16x128xf32, #tpu.memory_space<vmem>>, vector<16x128xf32>
    %c0_4 = arith.constant 0 : index
    %c0_5 = arith.constant 0 : index
    %5 = vector.load %arg4[%c0_4, %c0_5] : memref<128x128xf32, #tpu.memory_space<vmem>>, vector<128x128xf32>
    %cst = arith.constant dense<0.000000e+00> : vector<16x128xf32>
    %6 = tpu.matmul %4, %5, %cst {dimension_numbers = #tpu.dot_dimension_numbers<[1], [1], [0], [0], [0, 0, 1, 0], [], []>} : vector<16x128xf32>, vector<128x128xf32>, vector<16x128xf32> -> vector<16x128xf32>
    %7 = arith.addf %3, %6 : vector<16x128xf32>
    %c0_6 = arith.constant 0 : index
    %c0_7 = arith.constant 0 : index
    %8 = vector.load %arg7[%c0_6, %c0_7] : memref<16x128xf32, #tpu.memory_space<vmem>>, vector<16x128xf32>
    tpu.vector_store %arg7[%c0_6, %c0_7], %7 {strides = array<i32>} : memref<16x128xf32, #tpu.memory_space<vmem>>, vector<16x128xf32>,
    %c0_i32_8 = arith.constant 0 : i32
    %9 = arith.cmpi eq, %arg2, %c0_i32_8 : i32
    %10 = arith.extui %9 : i1 to i32
    %c0_i32_9 = arith.constant 0 : i32
    %11 = arith.cmpi ne, %10, %c0_i32_9 : i32
    scf.if %11 {
      %c0_10 = arith.constant 0 : index
      %c0_11 = arith.constant 0 : index
      %12 = vector.load %arg7[%c0_10, %c0_11] : memref<16x128xf32, #tpu.memory_space<vmem>>, vector<16x128xf32>
      %c0_12 = arith.constant 0 : index
      %c0_13 = arith.constant 0 : index
      %13 = vector.load %arg6[%c0_12, %c0_13] : memref<16x128xf32, #tpu.memory_space<vmem>>, vector<16x128xf32>
      tpu.vector_store %arg6[%c0_12, %c0_13], %12 {strides = array<i32>} : memref<16x128xf32, #tpu.memory_space<vmem>>, vector<16x128xf32>,
    } else {
    }
    return
  }
  func.func @transform_0(%arg0: i32, %arg1: i32, %arg2: i32) -> (i32, i32) {
    %c0_i32 = arith.constant 0 : i32
    return %arg0, %arg2 : i32, i32
  }
  func.func @transform_1(%arg0: i32, %arg1: i32, %arg2: i32) -> (i32, i32) {
    %c0_i32 = arith.constant 0 : i32
    return %arg1, %arg2 : i32, i32
  }
  func.func @transform_2(%arg0: i32, %arg1: i32, %arg2: i32) -> (i32, i32) {
    %c0_i32 = arith.constant 0 : i32
    %c0_i32_0 = arith.constant 0 : i32
    return %c0_i32, %arg1 : i32, i32
  }
  func.func @transform_3(%arg0: i32, %arg1: i32, %arg2: i32) -> (i32, i32) {
    %c0_i32 = arith.constant 0 : i32
    return %arg0, %arg1 : i32, i32
  }
}

</mosaic_0001>

<bundles_post_ra>
// kernel: lowrank_linear_forward.1
= control target key start
LH: loop header
LB: loop body
LE: loop exit
PB: predicated region body
PF: predicated region fallthrough
CT: control target
= control target key end

     0   :  { %s274_s1 = inlined_call_operand.vmem [shape: f32[128,128], index: 1, kind: input, shape index: {}]   ;;  %s275_s0 = inlined_call_operand.vmem [shape: f32[16,128], index: 0, kind: input, shape index: {}]   ;;  %s276_s2 = inlined_call_operand.vmem [shape: f32[1,128], index: 2, kind: input, shape index: {}]   ;;  %s277_s3 = inlined_call_operand.vmem [shape: f32[16,128], index: 3, kind: output, shape index: {}]  }
   0x1   :  { %v46_v0 = vld [vmem:[%s274_s1 + $0x78] sm:$0xff]  ;;  %v45_v1 = vld [vmem:[%s274_s1 + $0x70] sm:$0xff]  ;;  %v44_v2 = vld [vmem:[%s274_s1 + $0x68] sm:$0xff] }
   0x2   :  { %156 = vmatprep.subr.mxu0 %v46_v0  ;;  %v29_v3 = vld [vmem:[%s275_s0] sm:$0xff]  ;;  %v42_v5 = vld [vmem:[%s274_s1 + $0x58] sm:$0xff]  ;;  %v41_v6 = vld [vmem:[%s274_s1 + $0x50] sm:$0xff] }
   0x3   :  { %157 = vmatpush3.xpose.msra.mxu0 %v46_v0  ;;  %188 = vmatprep.mubr.f32.mxu0 %v29_v3  ;;  %v43_v4 = vld [vmem:[%s274_s1 + $0x60] sm:$0xff]  ;;  %v40_v7 = vld [vmem:[%s274_s1 + $0x48] sm:$0xff]  ;;  %v38_v9 = vld [vmem:[%s274_s1 + $0x38] sm:$0xff] }
   0x4   :  { %158 = vmatprep.subr.mxu0 %v45_v1  ;;  %v39_v8 = vld [vmem:[%s274_s1 + $0x40] sm:$0xff]  ;;  %v37_v10 = vld [vmem:[%s274_s1 + $0x30] sm:$0xff]  ;;  %v36_v11 = vld [vmem:[%s274_s1 + $0x28] sm:$0xff] }
   0x5   :  { %v35_v12 = vld [vmem:[%s274_s1 + $0x20] sm:$0xff]  ;;  %v34_v13 = vld [vmem:[%s274_s1 + $0x18] sm:$0xff]  ;;  %v33_v14 = vld [vmem:[%s274_s1 + $0x10] sm:$0xff] }
   0x6   :  { %v32_v15 = vld [vmem:[%s274_s1 + $0x8] sm:$0xff]  ;;  %v31_v16 = vld [vmem:[%s274_s1] sm:$0xff] }
   0x7   :  { %159 = vmatpush3.xpose.msra.mxu0 %v45_v1  ;;  %v30_v17 = vld [vmem:[%s275_s0 + $0x8] sm:$0xff]  ;;  %v137_v18 = vld [vmem:[%s276_s2] ss:$0 sm:$0xff] }
   0x8   :  { %160 = vmatprep.subr.mxu0 %v44_v2 }
   0xb   :  { %161 = vmatpush3.xpose.msra.mxu0 %v44_v2 }
   0xc   :  { %162 = vmatprep.subr.mxu0 %v43_v4 }
   0xf   :  { %163 = vmatpush3.xpose.msra.mxu0 %v43_v4 }
  0x10   :  { %164 = vmatprep.subr.mxu0 %v42_v5 }
  0x13   :  { %165 = vmatpush3.xpose.msra.mxu0 %v42_v5 }
  0x14   :  { %166 = vmatprep.subr.mxu0 %v41_v6 }
  0x17   :  { %167 = vmatpush3.xpose.msra.mxu0 %v41_v6 }
  0x18   :  { %168 = vmatprep.subr.mxu0 %v40_v7 }
  0x1b   :  { %169 = vmatpush3.xpose.msra.mxu0 %v40_v7 }
  0x1c   :  { %170 = vmatprep.subr.mxu0 %v39_v8 }
  0x1f   :  { %171 = vmatpush3.xpose.msra.mxu0 %v39_v8 }
  0x20   :  { %172 = vmatprep.subr.mxu0 %v38_v9 }
  0x23   :  { %173 = vmatpush3.xpose.msra.mxu0 %v38_v9 }
  0x24   :  { %174 = vmatprep.subr.mxu0 %v37_v10 }
  0x27   :  { %175 = vmatpush3.xpose.msra.mxu0 %v37_v10 }
  0x28   :  { %176 = vmatprep.subr.mxu0 %v36_v11 }
  0x2b   :  { %177 = vmatpush3.xpose.msra.mxu0 %v36_v11 }
  0x2c   :  { %178 = vmatprep.subr.mxu0 %v35_v12 }
  0x2f   :  { %179 = vmatpush3.xpose.msra.mxu0 %v35_v12 }
  0x30   :  { %180 = vmatprep.subr.mxu0 %v34_v13 }
  0x33   :  { %181 = vmatpush3.xpose.msra.mxu0 %v34_v13 }
  0x34   :  { %182 = vmatprep.subr.mxu0 %v33_v14 }
  0x37   :  { %183 = vmatpush3.xpose.msra.mxu0 %v33_v14 }
  0x38   :  { %184 = vmatprep.subr.mxu0 %v32_v15 }
  0x3b   :  { %185 = vmatpush3.xpose.msra.mxu0 %v32_v15 }
  0x3c   :  { %186 = vmatprep.subr.mxu0 %v31_v16 }
  0x3f   :  { %187 = vmatpush3.xpose.msra.mxu0 %v31_v16 }
  0x42   :  { %189 = vmatmul.mubr.f32.vlgmr.msra.gmra.mxu0 %v30_v17 }
 0x102   :  { %v190_v19 = vpop.f32.mrf.mxu0 }
 0x103   :  { %v123_v20 = vadd.f32 %v190_v19, %v137_v18 }
 0x104   :  { %v113_v21 = vpop.f32.mrf.mxu0 }
 0x105   :  { %132 = vst [vmem:[%s277_s3 + $0x8] sm:$0xff] %v123_v20  ;;  %v122_v22 = vadd.f32 %v137_v18, %v113_v21 }
 0x107   :  { %131 = vst [vmem:[%s277_s3] sm:$0xff] %v122_v22 }

</bundles_post_ra>
